<compile_context>
chip_gen: v5e
topology: v5e:2x2
jax: 0.10.0
libtpu: 0.0.40
codegen_flags: <defaults>
</compile_context>

<pallas_src>
import functools

import jax
import jax.numpy as jnp
from jax.experimental import pallas as pl
from jax.experimental.pallas import tpu as pltpu


def _gbn_kernel(x_ref, w_ref, b_ref, o_ref, *, inv_n: float, inv_nm1: float, eps: float):
    # x block: (TB, TG, Kp); padded lanes (if any) are zero -> sums are exact.
    x = x_ref[...].astype(jnp.float32)

    s1 = jnp.sum(x, axis=-1, keepdims=True)                    # (TB, TG, 1)
    s2 = jnp.sum(x * x, axis=-1, keepdims=True)                # (TB, TG, 1)
    mean = s1 * jnp.float32(inv_n)                             # (TB, TG, 1)
    # sum((x - mean)^2) over the TRUE lanes = s2 - n*mean^2 = s2 - s1*mean.
    ss = jnp.maximum(s2 - s1 * mean, jnp.float32(0.0))
    std = jnp.sqrt(ss * jnp.float32(inv_nm1))                  # unbiased (ddof=1)

    # eps added to std (torch semantics); exact reciprocal on the tiny stats array.
    inv = pl.reciprocal(std + jnp.float32(eps), approx=False)  # (TB, TG, 1)

    # Single fused scale/shift pass; store in the native output dtype.
    o_ref[...] = (((x - mean) * inv) * w_ref[...] + b_ref[...]).astype(o_ref.dtype)


def _pick_vmem_limit() -> int:
    """Scoped VMEM limit derived from the chip's physical VMEM."""
    phys = 128 << 20
    try:
        info = pltpu.get_tpu_info()
        cap = getattr(info, "vmem_capacity_bytes", None)
        if cap:
            phys = int(cap)
    except Exception:
        pass
    # ~65% of per-core VMEM, clamped to [32 MiB, 96 MiB]:
    #   v7x (64 MiB)      -> ~42 MiB
    #   v5e/v6e (128 MiB) -> ~83 MiB
    return int(min(max((phys * 13) // 20, 32 << 20), 96 << 20))


def _choose_tiles(N, G, Kp, in_item, out_item, vmem_limit):
    """Pick (tb, tg) so ~6 block-sized buffers fit in the VMEM budget."""
    budget = max(vmem_limit - (4 << 20), 8 << 20)
    # 2x double-buffered input + 2x double-buffered output + ~2 f32 block temps.
    per_elem = 2 * in_item + 2 * out_item + 2 * 4
    max_elems = max(budget // per_elem, Kp)

    # Groups per block: split G only when a single batch row of all groups is
    # already too big (robustness for huge C*L, esp. on v7x's 64 MiB VMEM).
    if G * Kp <= max_elems or G < 8:
        tg = G
    else:
        tg = min(G, max(8, ((max_elems // Kp) // 8) * 8))   # multiple of 8 (sublane rule)
    grid_g = pl.cdiv(G, tg)

    # Batch rows per block.
    tb = max(1, min(N, max_elems // (tg * Kp)))

    # Keep at least ~4 grid steps so v7x can feed both TensorCores and the DMA
    # pipeline has overlap; no effect when the grid is already long.
    min_steps = 4
    if pl.cdiv(N, tb) * grid_g < min_steps:
        need_n = min(N, pl.cdiv(min_steps, grid_g))
        tb = max(1, min(tb, pl.cdiv(N, need_n)))
    return tb, tg, grid_g


def group_batchnorm1d(x, weight, bias, *, group_num: int = 16, eps: float = 1e-10):
    """x: (N, C, L); weight/bias: (C,).  Returns (N, C, L) in x.dtype."""
    N, C, L = x.shape
    G = int(group_num)
    assert C >= G and C % G == 0, "C must be a positive multiple of group_num"
    cpg = C // G
    K = cpg * L
    assert K >= 2, "unbiased std (ddof=1) needs >= 2 elements per group"

    # Lane-dense last dim: pad K to a multiple of 128 (zeros don't perturb sums).
    Kp = ((K + 127) // 128) * 128

    # Group-major layout; no dtype cast in the wrapper (stream native dtype).
    xg = x.reshape(N, G, K)
    w2 = jnp.broadcast_to(
        weight.astype(jnp.float32).reshape(G, cpg, 1), (G, cpg, L)).reshape(G, K)
    b2 = jnp.broadcast_to(
        bias.astype(jnp.float32).reshape(G, cpg, 1), (G, cpg, L)).reshape(G, K)
    if Kp != K:
        pad = Kp - K
        xg = jnp.pad(xg, ((0, 0), (0, 0), (0, pad)))
        w2 = jnp.pad(w2, ((0, 0), (0, pad)))
        b2 = jnp.pad(b2, ((0, 0), (0, pad)))

    out_dtype = x.dtype
    in_item = jnp.dtype(x.dtype).itemsize
    out_item = jnp.dtype(out_dtype).itemsize

    vmem_limit = _pick_vmem_limit()
    tb, tg, grid_g = _choose_tiles(N, G, Kp, in_item, out_item, vmem_limit)
    grid_n = pl.cdiv(N, tb)

    kernel = functools.partial(
        _gbn_kernel, inv_n=1.0 / K, inv_nm1=1.0 / (K - 1), eps=float(eps))

    out = pl.pallas_call(
        kernel,
        out_shape=jax.ShapeDtypeStruct((N, G, Kp), out_dtype),
        grid_spec=pltpu.PrefetchScalarGridSpec(
            num_scalar_prefetch=0,
            grid=(grid_n, grid_g),
            in_specs=[
                pl.BlockSpec((tb, tg, Kp), lambda n, g: (n, g, 0)),
                pl.BlockSpec((tg, Kp), lambda n, g: (g, 0)),
                pl.BlockSpec((tg, Kp), lambda n, g: (g, 0)),
            ],
            out_specs=pl.BlockSpec((tb, tg, Kp), lambda n, g: (n, g, 0)),
        ),
        compiler_params=pltpu.CompilerParams(
            dimension_semantics=("parallel", "parallel"),   # both TCs on v7x
            vmem_limit_bytes=vmem_limit,
        ),
    )(xg, w2, b2)

    if Kp != K:
        out = out[:, :, :K]
    return out.reshape(N, C, L)


def _reference(x, weight, bias, group_num, eps):
    N, C, L = x.shape
    xg = x.reshape(N, group_num, -1)
    mean = xg.mean(axis=2, keepdims=True)
    std = jnp.std(xg, axis=2, keepdims=True, ddof=1)   # torch.std default: unbiased
    xg = (xg - mean) / (std + eps)
    xr = xg.reshape(N, C, L)
    return xr * weight.reshape(1, -1, 1) + bias.reshape(1, -1, 1)


if __name__ == "__main__":
    # Module config: c_num=8 channels, group_num=4 groups, eps=1e-10.
    N, C, L = 2, 8, 16
    group_num = 4
    eps = 1e-10

    key = jax.random.PRNGKey(0)
    kx, kw = jax.random.split(key)
    x = jax.random.normal(kx, (N, C, L), dtype=jnp.float32)
    weight = jax.random.normal(kw, (C,), dtype=jnp.float32)   # torch.randn(c_num)
    bias = jnp.zeros((C,), dtype=jnp.float32)                 # torch.zeros(c_num)

    out = group_batchnorm1d(x, weight, bias, group_num=group_num, eps=eps)
    out = jax.block_until_ready(out)

    ref = _reference(x, weight, bias, group_num, eps)
    assert out.shape == (N, C, L)
    assert jnp.allclose(out, ref, atol=1e-5, rtol=1e-5), "mismatch vs reference"

    print("KERNEL_OK")
</pallas_src>

<mosaic_0001>
module attributes {stable_mosaic.version = 11 : i64} {
  func.func @_gbn_kernel(%arg0: i32, %arg1: i32, %arg2: memref<1x4x128xf32, #tpu.memory_space<vmem>>, %arg3: memref<4x128xf32, #tpu.memory_space<vmem>>, %arg4: memref<4x128xf32, #tpu.memory_space<vmem>>, %arg5: memref<1x4x128xf32, #tpu.memory_space<vmem>>) attributes {dimension_semantics = [#tpu.dimension_semantics<parallel>, #tpu.dimension_semantics<parallel>], iteration_bounds = array<i64: 2, 1>, scalar_prefetch = 0 : i64, scratch_operands = 0 : i64, tpu.core_type = #tpu.core_type<tc>, window_params = [{transform_indices = @transform_0, window_bounds = array<i64: 1, 4, 128>}, {transform_indices = @transform_1, window_bounds = array<i64: 4, 128>}, {transform_indices = @transform_2, window_bounds = array<i64: 4, 128>}, {transform_indices = @transform_3, window_bounds = array<i64: 1, 4, 128>}]} {
    %c0 = arith.constant 0 : index
    %c0_0 = arith.constant 0 : index
    %c0_1 = arith.constant 0 : index
    %0 = vector.load %arg2[%c0, %c0_0, %c0_1] : memref<1x4x128xf32, #tpu.memory_space<vmem>>, vector<1x4x128xf32>
    %cst = arith.constant dense<0.000000e+00> : vector<1x4xf32>
    %1 = vector.multi_reduction <add>, %0, %cst [2] : vector<1x4x128xf32> to vector<1x4xf32>
    %2 = vector.shape_cast %1 : vector<1x4xf32> to vector<1x4x1xf32>
    %3 = arith.mulf %0, %0 : vector<1x4x128xf32>
    %cst_2 = arith.constant dense<0.000000e+00> : vector<1x4xf32>
    %4 = vector.multi_reduction <add>, %3, %cst_2 [2] : vector<1x4x128xf32> to vector<1x4xf32>
    %5 = vector.shape_cast %4 : vector<1x4xf32> to vector<1x4x1xf32>
    %cst_3 = arith.constant 3.125000e-02 : f32
    %6 = vector.broadcast %cst_3 : f32 to vector<1x4x1xf32>
    %7 = arith.mulf %2, %6 : vector<1x4x1xf32>
    %8 = arith.mulf %2, %7 : vector<1x4x1xf32>
    %9 = arith.subf %5, %8 : vector<1x4x1xf32>
    %cst_4 = arith.constant 0.000000e+00 : f32
    %10 = vector.broadcast %cst_4 : f32 to vector<1x4x1xf32>
    %11 = arith.maximumf %9, %10 : vector<1x4x1xf32>
    %cst_5 = arith.constant 0.0322580636 : f32
    %12 = vector.broadcast %cst_5 : f32 to vector<1x4x1xf32>
    %13 = arith.mulf %11, %12 : vector<1x4x1xf32>
    %14 = math.sqrt %13 : vector<1x4x1xf32>
    %cst_6 = arith.constant 1.000000e-10 : f32
    %15 = vector.broadcast %cst_6 : f32 to vector<1x4x1xf32>
    %16 = arith.addf %14, %15 : vector<1x4x1xf32>
    %17 = tpu.reciprocal %16 : vector<1x4x1xf32> -> vector<1x4x1xf32>
    %18 = vector.broadcast %7 : vector<1x4x1xf32> to vector<1x4x128xf32>
    %19 = arith.subf %0, %18 : vector<1x4x128xf32>
    %20 = vector.broadcast %17 : vector<1x4x1xf32> to vector<1x4x128xf32>
    %21 = arith.mulf %19, %20 : vector<1x4x128xf32>
    %c0_7 = arith.constant 0 : index
    %c0_8 = arith.constant 0 : index
    %22 = vector.load %arg3[%c0_7, %c0_8] : memref<4x128xf32, #tpu.memory_space<vmem>>, vector<4x128xf32>
    %23 = vector.shape_cast %22 : vector<4x128xf32> to vector<1x4x128xf32>
    %24 = arith.mulf %21, %23 : vector<1x4x128xf32>
    %c0_9 = arith.constant 0 : index
    %c0_10 = arith.constant 0 : index
    %25 = vector.load %arg4[%c0_9, %c0_10] : memref<4x128xf32, #tpu.memory_space<vmem>>, vector<4x128xf32>
    %26 = vector.shape_cast %25 : vector<4x128xf32> to vector<1x4x128xf32>
    %27 = arith.addf %24, %26 : vector<1x4x128xf32>
    %c0_11 = arith.constant 0 : index
    %c0_12 = arith.constant 0 : index
    %c0_13 = arith.constant 0 : index
    %28 = vector.load %arg5[%c0_11, %c0_12, %c0_13] : memref<1x4x128xf32, #tpu.memory_space<vmem>>, vector<1x4x128xf32>
    tpu.vector_store %arg5[%c0_11, %c0_12, %c0_13], %27 {strides = array<i32>} : memref<1x4x128xf32, #tpu.memory_space<vmem>>, vector<1x4x128xf32>,
    return
  }
  func.func @transform_0(%arg0: i32, %arg1: i32) -> (i32, i32, i32) {
    %c0_i32 = arith.constant 0 : i32
    %c0_i32_0 = arith.constant 0 : i32
    return %arg0, %arg1, %c0_i32 : i32, i32, i32
  }
  func.func @transform_1(%arg0: i32, %arg1: i32) -> (i32, i32) {
    %c0_i32 = arith.constant 0 : i32
    %c0_i32_0 = arith.constant 0 : i32
    return %arg1, %c0_i32 : i32, i32
  }
  func.func @transform_2(%arg0: i32, %arg1: i32) -> (i32, i32) {
    %c0_i32 = arith.constant 0 : i32
    %c0_i32_0 = arith.constant 0 : i32
    return %arg1, %c0_i32 : i32, i32
  }
  func.func @transform_3(%arg0: i32, %arg1: i32) -> (i32, i32, i32) {
    %c0_i32 = arith.constant 0 : i32
    %c0_i32_0 = arith.constant 0 : i32
    return %arg0, %arg1, %c0_i32 : i32, i32, i32
  }
}

</mosaic_0001>

<bundles_post_ra>
// kernel: tpu_custom_call.1
= control target key start
LH: loop header
LB: loop body
LE: loop exit
PB: predicated region body
PF: predicated region fallthrough
CT: control target
= control target key end

     0   :  { %8 = vsyncpa [#allocation3], 0  ;;  %s866_s0 = inlined_call_operand.hbm [shape: f32[2,4,128], index: 0, kind: input, shape index: {}]   ;;  %s867_s1 = inlined_call_operand.hbm [shape: f32[4,128], index: 1, kind: input, shape index: {}]   ;;  %s868_s2 = inlined_call_operand.hbm [shape: f32[4,128], index: 2, kind: input, shape index: {}]   ;;  %s869_s3 = inlined_call_operand.hbm [shape: f32[2,4,128], index: 3, kind: output, shape index: {}]  }
   0x1   :  { %10 = vsyncpa [#allocation3 + $0x1], 0 }
   0x2   :  { %11 = vsyncpa [#allocation6], 0 }
   0x3   :  { %12 = vsyncpa [#allocation4], 0 }
   0x4   :  { %14 = vsyncpa [#allocation4 + $0x1], 0  ;;  %s720_s12 = smov 0   ;;  %s722_s13 = smov 0  }
   0x5   :  { %s724_s14 = smov 0   ;;  %s726_s15 = smov 0  }
   0x6   :  { %s728_s16 = smov 0   ;;  %s730_s17 = smov 0  }
   0x7 LB: > { %s416_s18 = sadd.s32 4294967295, %s696_s17   ;;  %s417_s19 = sadd.s32 4294967294, %s696_s17   ;;  %s696_s17 = sphi %s730_s17, %s20_s17   ;;  %s692_s16 = sphi %s728_s16, %s879_s16   ;;  %s688_s15 = sphi %s726_s15, %s878_s15   ;;  %s684_s14 = sphi %s724_s14, %s877_s14   ;;  %s680_s13 = sphi %s722_s13, %s876_s13   ;;  %s676_s12 = sphi %s720_s12, %s875_s12  }
   0x8   : > { %p54_p0 = scmp.ne.s32.totalorder %s680_s13, %s676_s12  ;;  %p754_p1 = scmp.eq.s32.totalorder %s416_s18, 0 }
   0x9   : > { %p138_p2 = scmp.eq.s32.totalorder %s417_s19, 1  ;;  %p418_p4 = scmp.ge.s32.totalorder %s696_s17, 1 }
   0xa   : > { %p760_p3 = por %p754_p1, %p54_p0  ;;  %p145_p6 = scmp.lt.s32.totalorder %s696_s17, 3 }
   0xb   : > { %p765_p5 = por %p138_p2, %p54_p0  ;;  %s159_s25 = sshll.u32 %s867_s1, 4  ;;  %s160_s25 = int_to_ptr.hbm [resolvable:$true] %s159_s25 }
   0xc   : > { %p773_p7 = pnand %p418_p4, %p145_p6  ;;  %p421_p8 = scmp.ge.s32.totalorder %s696_s17, 2 }
   0xd   : > { %s698_s27 = smov [#allocation5]   ;;  %s173_s4 = sshll.u32 %s868_s2, 4  ;;  %s174_s4 = int_to_ptr.hbm [resolvable:$true] %s173_s4 }
   0xe   : > { %p445_p9 = pneg %p773_p7  ;;  %s161_s28 = sshll.u32 %s698_s27, 4  ;;  %s162_s28 = int_to_ptr.vmem [resolvable:$true] %s161_s28 }
   0xf   : > { %s699_s5 = smov [#allocation7]   ;;  %p132_p11 = scmp.eq.s32.totalorder %s416_s18, 1 }
  0x10   : > { %p446_p10 = pnand %p445_p9, %p754_p1  ;;  %s175_s6 = sshll.u32 %s699_s5, 4  ;;  %s176_s6 = int_to_ptr.vmem [resolvable:$true] %s175_s6 }
  0x11   : > { %s32_s7 = sadd.s32 1, %s692_s16  ;;  %s41_s8 = sadd.s32 1, %s684_s14 }
  0x12   : > { %448 = dma.hbm_to_vmem [thread:$0]  (!%p446_p10), %s160_s25, 64, %s162_s28, [#allocation6]  }
  0x13   : > { %451 = dma.hbm_to_vmem [thread:$0]  (!%p446_p10), %s174_s4, 64, %s176_s6, [#allocation6]  }
  0x14   : > { %p34_p12 = scmp.ge.s32.totalorder %s32_s7, 2  ;;  %p48_p13 = scmp.ne.s32.totalorder %s684_s14, %s680_s13 }
  0x15   : > { %p49_p0 = scmp.eq.s32.totalorder %s696_s17, 0  ;;  %p462_p4 = scmp.lt.s32.totalorder %s696_s17, 2 }
  0x16   : > { %s881_s7 = smov (%p34_p12, %s32_s7), 0  ;;  %p792_p2 = por %p132_p11, %p48_p13 }
  0x17   : > { %s36_s10 = ssub.s32 %s692_s16, %s881_s7  ;;  %s186_s11 = sand.u32 1, %s684_s14  }
  0x18   : > { %p39_p6 = scmp.eq.s32.totalorder %s36_s10, 0  ;;  %p50_p9 = por %p49_p0, %p48_p13 }
  0x19   : > { %s422_s19 = sshll.u32 %s186_s11, 2  ;;  %s423_s18 = sshll.u32 %s692_s16, 2 }
  0x1a   : > { %s802_s23 = scalar_select %p39_p6, %s684_s14, %s41_s8  }
  0x1b   : > { %s195_s27 = scalar_lea.hbm %s866_s0, %s423_s18  ;;  %s190_s29 = scalar_lea.vmem [#allocation2], %s422_s19 }
  0x1c   : > { %s197_s28 = sshll.u32 %s195_s27, 4  ;;  %s199_s30 = sshll.u32 %s190_s29, 4  ;;  %s198_s28 = int_to_ptr.hbm [resolvable:$true] %s197_s28  ;;  %s200_s30 = int_to_ptr.vmem [resolvable:$true] %s199_s30 }
  0x1d   : > { %p453_p10 = pnand %p462_p4, %p50_p9  ;;  %s187_s4 = scalar_lea.sflag [#allocation3], %s186_s11 }
  0x1e   : > { %208 = sbr.rel (%p773_p7) target bundleno = 219 (0xdb), region = 32  ;;  %s812_s5 = sand.u32 (!%p773_p7), 1, %s680_s13  }
  0x1f   : > { %455 = dma.hbm_to_vmem [thread:$0]  (!%p453_p10), %s198_s28, 64, %s200_s30, %s187_s4  }
  0x20   : > { %s425_s6 = sshll.u32 (!%p773_p7), %s812_s5, 2  ;;  %s211_s8 = scalar_lea.sflag (!%p773_p7), [#allocation3], %s812_s5 }
  0x21   : > { %s214_s10 = scalar_lea.vmem (!%p773_p7), [#allocation2], %s425_s6 }
  0x23   : > { %663 = dma.done.wait (%p760_p3), %s211_s8, 64  }
  0x24   : > { %665 = vsyncadd (%p760_p3), %s211_s8, 4294967232 }
  0x25   : > { %667 = dma.done.wait (%p754_p1), [#allocation6], 128  }
  0x26   : > { %669 = vsyncadd (%p754_p1), [#allocation6], 4294967168  ;;  %vm249_vm0 = vcmask 1043456   ;;  %v248_v0 = vld [vmem:[%s214_s10] sm:$0xf]  ;;  %s430_s20 = sshll.u32 %s688_s15, 2 }
  0x27   : > { %v250_v1 = vsel %vm249_vm0, %v248_v0, 0.0  ;;  %v253_v2 = vmul.f32 %v248_v0, %v248_v0  ;;  %s308_s11 = scalar_lea.hbm %s869_s3, %s430_s20  ;;  %v291_v33 = vld [vmem:[#allocation5] sm:$0xf]  ;;  %v293_v35 = vld [vmem:[#allocation7] sm:$0xf]  ;;  %s247_s19 = scalar_lea.vmem [#allocation8], %s425_s6 }
  0x28   : > { %251 = vadd.xlane.f32.xlu0 %v250_v1  ;;  %s310_s15 = sshll.u32 %s247_s19, 4  ;;  %s312_s18 = sshll.u32 %s308_s11, 4  ;;  %s311_s15 = int_to_ptr.vmem [resolvable:$true] %s310_s15  ;;  %s313_s18 = int_to_ptr.hbm [resolvable:$true] %s312_s18 }
  0x29   : > { %v254_v3 = vsel %vm249_vm0, %v253_v2, 0.0  ;;  %s297_s24 = scalar_lea.sflag [#allocation4], %s812_s5  ;;  %s624_s25 = sshra.s32 %s313_s18, 4  ;;  %s625_s25 = int_to_ptr.hbm [resolvable:$true] %s624_s25 }
  0x2a   : > { %s626_s27 = scalar_lea.hbm %s625_s25, 4  ;;  %s630_s30 = scalar_lea.hbm %s869_s3, 8 }
  0x2b   : > { %p627_p1 = scmp.ne.s32.totalorder %s625_s25, %s626_s27  ;;  %p631_p11 = scmp.lt.s32.totalorder %s625_s25, %s869_s3 }
  0x2c   : > { %p632_p12 = scmp.lt.s32.totalorder %s630_s30, %s626_s27 }
  0x2d   : > { %p628_p3 = pnand %p627_p1, %p792_p2 }
  0x2e   : > { %p633_p13 = por %p632_p12, %p631_p11 }
  0x2f   : > { %p629_p7 = pneg %p628_p3 }
  0x30   : > { %255 = vadd.xlane.f32.xlu0 %v254_v3 }
  0x31   : > { %p634_p0 = pnand %p633_p13, %p629_p7 }
  0x9b   : > { %v252_v4 = vpop.xlane.xlu0 %251 }
  0x9c   : > { %v257_v5 = vmul.f32 0.03125, %v252_v4 }
  0x9e   : > { %v258_v6 = vmul.f32 %v257_v5, %v252_v4  ;;  %v289_v30 = vsub.f32 %v248_v0, %v257_v5 }
  0xa3   : > { %v256_v7 = vpop.xlane.xlu0 %255 }
  0xa4   : > { %v259_v8 = vsub.f32 %v256_v7, %v258_v6 }
  0xa6   : > { %v260_v9 = vmax.f32 %v259_v8, 0.0 }
  0xa8   : > { %v261_v10 = vmul.f32 0.032258064, %v260_v9 }
  0xaa   : > { %516 = vrsqrt.f32 %v261_v10  ;;  %vm269_vm1 = vcmp.eq.f32.partialorder %v261_v10, inf  ;;  %v272_v18 = vand.u32 2147483648, %v261_v10  ;;  %vm271_vm2 = vcmp.eq.f32.partialorder %v261_v10, 0.0 }
  0xb0   : > { %v517_v11 = vpop.eup %516 }
  0xb1   : > { %v263_v12 = vmul.f32 %v517_v11, %v261_v10 }
  0xb3   : > { %v264_v13 = vmul.f32 %v517_v11, %v263_v12 }
  0xb5   : > { %v265_v14 = vmul.f32 0.5, %v264_v13 }
  0xb7   : > { %v266_v15 = vsub.f32 1.5, %v265_v14 }
  0xb9   : > { %v267_v16 = vmul.f32 %v517_v11, %v266_v15 }
  0xbb   : > { %v268_v17 = vmul.f32 %v267_v16, %v261_v10 }
  0xbd   : > { %v270_v19 = vsel %vm269_vm1, %v261_v10, %v268_v17 }
  0xbe   : > { %v273_v20 = vsel %vm271_vm2, %v272_v18, %v270_v19 }
  0xbf   : > { %v274_v21 = vadd.f32 1e-10, %v273_v20 }
  0xc1   : > { %518 = vrcp.f32 %v274_v21  ;;  %v286_v25 = vand.u32 2147483648, %v274_v21  ;;  %v284_v27 = vand.u32 2147483647, %v274_v21  ;;  %vm280_vm4 = vweird.f32 %v274_v21 }
  0xc3   : > { %v287_v29 = vor.u32 1.1754944e-38, %v286_v25  ;;  %vm285_vm6 = vcmp.eq.f32.partialorder %v284_v27, 8.507059e+37 }
  0xc7   : > { %v519_v22 = vpop.eup %518 }
  0xc8   : > { %v276_v23 = vmul.f32 %v519_v22, %v274_v21  ;;  %vm281_vm3 = vweird.f32 %v519_v22 }
  0xc9   : > { %vm282_vm5 = vmor %vm280_vm4, %vm281_vm3 }
  0xca   : > { %v277_v24 = vsub.f32 1.0, %v276_v23 }
  0xcc   : > { %v278_v26 = vmul.f32 %v519_v22, %v277_v24 }
  0xce   : > { %v279_v28 = vadd.f32 %v519_v22, %v278_v26 }
  0xd0   : > { %v283_v31 = vsel %vm282_vm5, %v519_v22, %v279_v28 }
  0xd1   : > { %v288_v32 = vsel %vm285_vm6, %v287_v29, %v283_v31 }
  0xd2   : > { %v290_v34 = vmul.f32 %v289_v30, %v288_v32 }
  0xd4   : > { %v292_v36 = vmul.f32 %v291_v33, %v290_v34 }
  0xd6   : > { %v294_v37 = vadd.f32 %v293_v35, %v292_v36 }
  0xd8   : > { %295 = vst [vmem:[%s247_s19] sm:$0xf] %v294_v37 }
  0xd9   : > { %637 = shalt.err (!%p634_p0)
}
  0xda   : > { %443 = dma.vmem_to_hbm [thread:$0]  (%p792_p2), %s311_s15, 64, %s313_s18, %s297_s24  }
  0xdb PF: > { %s324_s5 = sand.u32 1, %s676_s12   ;;  %p457_p4 = pnand %p421_p8, %p765_p5 }
  0xdc   : > { %s325_s8 = scalar_lea.sflag [#allocation4], %s324_s5 }
  0xdd   : > { %p458_p6 = pneg %p457_p4 }
  0xdf   : > { %671 = dma.done.wait (%p458_p6), %s325_s8, 64  }
  0xe0   : > { %673 = vsyncadd (%p458_p6), %s325_s8, 4294967232  ;;  %s20_s17 = sadd.s32 1, %s696_s17   ;;  %s875_s12 = smov %s680_s13 }
  0xe1   : > { %p17_p9 = scmp.ge.s32.totalorder %s20_s17, 4   ;;  %s876_s13 = smov %s684_s14 }
  0xe2   : > { %s877_s14 = smov %s802_s23  ;;  %s878_s15 = smov %s692_s16 }
  0xe3   : > { %s879_s16 = smov %s881_s7  ;;  %19 = sbr.rel (!%p17_p9) target bundleno = 7 (0x7), region = 87 }
  0xe8   :  { %331 = vsyncpa [#allocation3], 1 }
  0xe9   :  { %333 = vsyncpa [#allocation3 + $0x1], 1 }
  0xea   :  { %334 = vsyncpa [#allocation6], 1 }
  0xeb   :  { %335 = vsyncpa [#allocation4], 1 }
  0xec   :  { %337 = vsyncpa [#allocation4 + $0x1], 1 }

</bundles_post_ra>
